<compile_context>
chip_gen: v7x
topology: tpu7x:2x2x1
jax: 0.10.0
libtpu: 0.0.40
codegen_flags: <defaults>
</compile_context>

<pallas_src>
import functools

import jax
import jax.numpy as jnp
from jax.experimental import pallas as pl
from jax.experimental.pallas import tpu as pltpu

_MiB = 1024 * 1024


def _self_attn_flash_kernel(qf_ref, xres_ref, kf_ref, vx_ref, o_ref,
                            m_sc, acc_sc, *, c, tk, n_real, n_pad,
                            kv_resident, compute_dtype):
    """One (batch, q-tile, kv-tile) grid step.

    qf_ref   : (1, Cd, tq)         query-side features (fold: Wk Wq^T x + Wk bq;
                                    low-rank: Wq^T x + bq), channel-major.
    xres_ref : (1, C, tq)          residual input tokens.
    kf_ref   : (1, Cd, tk|Npad)    key-side features (fold: x; low-rank: Wk^T x).
    vx_ref   : (1, C+1, tk|Npad)   gamma*(Wv x + bv) with a ones row appended
                                    (row C) so the softmax denominator falls out
                                    of the MXU accumulator matmul.
    o_ref    : (1, C, tq)          output tile (channel-major, lane-dense).
    m_sc     : (1, tq)             running row max.
    acc_sc   : (C+1, tq)           running accumulator; row C = denominator l.
    """
    ki = pl.program_id(2)

    @pl.when(ki == 0)
    def _init():
        m_sc[...] = jnp.full(m_sc.shape, -jnp.inf, dtype=jnp.float32)
        acc_sc[...] = jnp.zeros(acc_sc.shape, dtype=jnp.float32)

    if kv_resident:
        # kv-side features are resident in VMEM for the whole batch: slice the
        # current kv tile out locally instead of re-streaming it from HBM.
        start = pl.multiple_of(ki * tk, tk)
        k_t = kf_ref[0, :, pl.ds(start, tk)]            # (Cd, tk)
        v_t = vx_ref[0, :, pl.ds(start, tk)]            # (C+1, tk)
    else:
        k_t = kf_ref[0]                                 # (Cd, tk)
        v_t = vx_ref[0]                                 # (C+1, tk)

    qf = qf_ref[0]                                      # (Cd, tq)

    # Transposed energy tile s_t[j, i] = kfeat_j . qfeat_i: contract the channel
    # (sublane) axis of both operands directly -> no materialized transpose.
    s_t = jax.lax.dot_general(
        k_t.astype(compute_dtype), qf.astype(compute_dtype),
        dimension_numbers=(((0,), (0,)), ((), ())),
        preferred_element_type=jnp.float32)             # (tk, tq)

    if n_real != n_pad:
        # Mask padded key tokens (padding only exists past n_real, and every kv
        # tile contains at least one real key, so no column is fully masked).
        key_idx = ki * tk + jax.lax.broadcasted_iota(jnp.int32, (tk, 1), 0)
        s_t = jnp.where(key_idx < n_real, s_t, jnp.float32(-1e30))

    # Online softmax across kv tiles.
    m_prev = m_sc[...]
    m_new = jnp.maximum(m_prev, jnp.max(s_t, axis=0, keepdims=True))   # (1, tq)
    alpha = jnp.exp(m_prev - m_new)                                    # (1, tq)
    p = jnp.exp(s_t - m_new)                                           # (tk, tq)
    m_sc[...] = m_new

    # acc[c, i] = alpha*acc[c, i] + sum_j v_ext[c, j] p[j, i].
    # The ones row of v_ext makes row C accumulate sum_j p[j, i] (the softmax
    # denominator), so no separate column reduce of p is needed.
    acc_sc[...] = alpha * acc_sc[...] + jnp.dot(
        v_t.astype(compute_dtype), p.astype(compute_dtype),
        preferred_element_type=jnp.float32)

    @pl.when(ki == pl.num_programs(2) - 1)
    def _finalize():
        # Exact reciprocal: runs once per q-tile, off the hot kv loop.
        inv_l = pl.reciprocal(acc_sc[c:c + 1, :], approx=False)        # (1, tq)
        o_ref[0] = (acc_sc[:c, :] * inv_l
                    + xres_ref[0].astype(jnp.float32)).astype(o_ref.dtype)


def _pick_tile(n, target):
    """Largest multiple of 128 that is <= target and divides n; n if n <= target."""
    if n <= target:
        return n
    t = (min(target, n) // 128) * 128
    while t >= 128:
        if n % t == 0:
            return t
        t -= 128
    return n


def _pad_channel_rows(a, mult=8):
    """Zero-pad axis 1 to a multiple of `mult` (zero rows contribute 0 to dots)."""
    r = a.shape[1]
    r_pad = ((r + mult - 1) // mult) * mult
    if r_pad != r:
        a = jnp.pad(a, ((0, 0), (0, r_pad - r), (0, 0)))
    return a


def self_attn_pallas(x_nchw, wq, bq, wk, bk, wv, bv, gamma, *,
                     tile_q=256, tile_k=512,
                     compute_dtype=jnp.float32,
                     kv_resident=None,
                     kv_resident_budget_bytes=40 * _MiB):
    """SelfAttn forward (matches the PyTorch module).

    x_nchw : (B, C, W, H)
    wq, wk : (C, C//8)   1x1-conv kernels stored as (Cin, Cout) matrices
    bq, bk : (C//8,)
    wv     : (C, C)      (Cin, Cout)
    bv     : (C,)
    gamma  : (1,)

    bk only shifts each softmax row by a constant, so it never enters the
    computation (kept in the signature for API parity with the PyTorch module).
    compute_dtype=jnp.bfloat16 enables bf16 MXU inputs with f32 accumulation
    (2-4x MXU throughput on v6e/v7x) at a deliberately looser tolerance.
    """
    B, C, W, H = x_nchw.shape
    N = W * H
    f32 = jnp.float32
    out_dtype = x_nchw.dtype

    # Channel-major token layout: a free reshape of NCHW (no HBM transpose).
    x_cn = x_nchw.reshape(B, C, N)

    # Pad the token axis to a multiple of 128 (lane width); padded keys are
    # masked inside the kernel, padded query tokens are sliced off afterwards.
    n_pad = max(128, ((N + 127) // 128) * 128)
    if n_pad != N:
        x_cn = jnp.pad(x_cn, ((0, 0), (0, 0), (0, n_pad - N)))

    g = gamma.astype(f32).reshape(())

    # Value projection with gamma and bias folded in, computed ONCE per token in
    # XLA (softmax rows sum to 1 => bias folding is exact).  A ones row is
    # appended so the softmax denominator falls out of the MXU matmul.
    v_cn = (jnp.einsum("co,bcn->bon", wv.astype(f32), x_cn.astype(f32)) * g
            + (g * bv.astype(f32))[None, :, None])                     # (B, C, Np)
    v_ext = jnp.concatenate(
        [v_cn, jnp.ones((B, 1, n_pad), f32)], axis=1)                  # (B, C+1, Np)

    # Query/key features.  Fold the low-rank projections into one CxC bilinear
    # form only when C is small; for large C keep the C/8 low-rank features so
    # the O(N^2) energy matmul does not pay a C-deep contraction.
    use_fold = C <= 128
    if use_fold:
        wqk = jnp.dot(wk.astype(f32), wq.astype(f32).T)                # (C, C)
        c_q = jnp.dot(wk.astype(f32), bq.astype(f32))                  # (C,)
        qfeat = (jnp.einsum("ce,ben->bcn", wqk, x_cn.astype(f32))
                 + c_q[None, :, None])                                 # (B, C, Np)
        kfeat = x_cn                                                   # (B, C, Np)
    else:
        qfeat = (jnp.einsum("eo,ben->bon", wq.astype(f32), x_cn.astype(f32))
                 + bq.astype(f32)[None, :, None])                      # (B, Cq, Np)
        kfeat = jnp.einsum("eo,ben->bon", wk.astype(f32), x_cn.astype(f32))
    # Keep the contraction (sublane) axis a multiple of 8 (zero rows are exact).
    qfeat = _pad_channel_rows(qfeat)
    kfeat = _pad_channel_rows(kfeat)
    cd = qfeat.shape[1]

    # Token tiling (tq / tk decoupled).
    tq = _pick_tile(n_pad, tile_q)
    tk = _pick_tile(n_pad, tile_k)
    # v7x has 2 TensorCores: make sure at least 2 grid points are parallel.
    if B * (n_pad // tq) < 2:
        tq_small = _pick_tile(n_pad, max(128, tq // 2))
        if B * (n_pad // tq_small) >= 2:
            tq = tq_small
    nq = n_pad // tq
    nk = n_pad // tk

    def nbytes(dt):
        return jnp.dtype(dt).itemsize

    # VMEM footprint estimates (double-buffered inputs/outputs + scratch).
    kv_tile_bytes = 2 * tk * (cd * nbytes(kfeat.dtype) + (C + 1) * nbytes(v_ext.dtype))
    kv_full_bytes = 2 * n_pad * (cd * nbytes(kfeat.dtype) + (C + 1) * nbytes(v_ext.dtype))
    q_bytes = 2 * tq * (cd * nbytes(qfeat.dtype) + C * nbytes(x_cn.dtype)
                        + C * nbytes(out_dtype))
    scratch_bytes = 4 * tq * (C + 2)

    if kv_resident is None:
        kv_resident = (nk > 1 and
                       kv_full_bytes + q_bytes + scratch_bytes
                       <= kv_resident_budget_bytes)

    need_bytes = ((kv_full_bytes if kv_resident else kv_tile_bytes)
                  + q_bytes + scratch_bytes)
    cp_kwargs = dict(dimension_semantics=("parallel", "parallel", "arbitrary"))
    if need_bytes > 14 * _MiB:
        # Re-derive the scoped-VMEM budget explicitly (v7x: 64 MiB physical /
        # 32 MiB default scoped; v5e default scoped is only 16 MiB).
        cp_kwargs["vmem_limit_bytes"] = int(min(need_bytes + 8 * _MiB, 48 * _MiB))

    if kv_resident:
        kf_spec = pl.BlockSpec((1, cd, n_pad), lambda b, qi, ki: (b, 0, 0))
        vx_spec = pl.BlockSpec((1, C + 1, n_pad), lambda b, qi, ki: (b, 0, 0))
    else:
        kf_spec = pl.BlockSpec((1, cd, tk), lambda b, qi, ki: (b, 0, ki))
        vx_spec = pl.BlockSpec((1, C + 1, tk), lambda b, qi, ki: (b, 0, ki))

    kernel = functools.partial(
        _self_attn_flash_kernel, c=C, tk=tk, n_real=N, n_pad=n_pad,
        kv_resident=kv_resident, compute_dtype=compute_dtype)

    out_cn = pl.pallas_call(
        kernel,
        out_shape=jax.ShapeDtypeStruct((B, C, n_pad), out_dtype),
        grid_spec=pltpu.PrefetchScalarGridSpec(
            num_scalar_prefetch=0,
            grid=(B, nq, nk),
            in_specs=[
                pl.BlockSpec((1, cd, tq), lambda b, qi, ki: (b, 0, qi)),   # q features
                pl.BlockSpec((1, C, tq), lambda b, qi, ki: (b, 0, qi)),    # residual x
                kf_spec,                                                   # k features
                vx_spec,                                                   # V (+ ones row)
            ],
            out_specs=pl.BlockSpec((1, C, tq), lambda b, qi, ki: (b, 0, qi)),
            scratch_shapes=[
                pltpu.VMEM((1, tq), jnp.float32),        # running max
                pltpu.VMEM((C + 1, tq), jnp.float32),    # accumulator (+ denom row)
            ],
        ),
        compiler_params=pltpu.CompilerParams(**cp_kwargs),
    )(qfeat, x_cn, kfeat, v_ext)

    if n_pad != N:
        out_cn = out_cn[:, :, :N]
    return out_cn.reshape(B, C, W, H)


def self_attn_reference(x_nchw, wq, bq, wk, bk, wv, bv, gamma):
    """Pure-JAX reference mirroring the PyTorch forward exactly."""
    B, C, W, H = x_nchw.shape
    N = W * H
    xf = x_nchw.reshape(B, C, N)                                   # (B, C, N)
    q = jnp.einsum("co,bcn->bon", wq, xf) + bq[None, :, None]      # (B, Cq, N)
    k = jnp.einsum("co,bcn->bon", wk, xf) + bk[None, :, None]      # (B, Cq, N)
    v = jnp.einsum("co,bcn->bon", wv, xf) + bv[None, :, None]      # (B, C, N)
    proj_query = jnp.transpose(q, (0, 2, 1))                       # (B, N, Cq)
    energy = jnp.einsum("bnc,bcm->bnm", proj_query, k)             # (B, N, N)
    attention = jax.nn.softmax(energy, axis=-1)
    out = jnp.einsum("bcn,bmn->bcm", v, attention)                 # (B, C, N)
    out = out.reshape(B, C, W, H)
    return gamma[0] * out + x_nchw


if __name__ == "__main__":
    key = jax.random.PRNGKey(0)

    def make_inputs(k, B, C, W, H):
        Cq = C // 8
        ks = jax.random.split(k, 7)
        x = jax.random.normal(ks[0], (B, C, W, H), dtype=jnp.float32)
        wq = jax.random.normal(ks[1], (C, Cq), dtype=jnp.float32) * 0.1
        bq = jax.random.normal(ks[2], (Cq,), dtype=jnp.float32) * 0.1
        wk = jax.random.normal(ks[3], (C, Cq), dtype=jnp.float32) * 0.1
        bk = jax.random.normal(ks[4], (Cq,), dtype=jnp.float32) * 0.1
        wv = jax.random.normal(ks[5], (C, C), dtype=jnp.float32) * 0.1
        bv = jax.random.normal(ks[6], (C,), dtype=jnp.float32) * 0.1
        gamma = jnp.array([0.5], dtype=jnp.float32)   # nonzero so attention matters
        return (x, wq, bq, wk, bk, wv, bv, gamma)

    cases = [
        # (name, (B, C, W, H), pallas kwargs)
        ("fold / kv-resident multi-tile", (2, 32, 16, 16),
         dict(tile_q=128, tile_k=128)),                      # grid (2,2,2), kv resident
        ("fold / kv-streaming multi-tile", (2, 32, 16, 16),
         dict(tile_q=128, tile_k=128, kv_resident=False)),   # streamed kv path
        ("fold / padded tokens (N=81)", (1, 16, 9, 9),
         dict()),                                            # pad to 128, masked keys
        ("low-rank q/k path (C>128)", (1, 160, 16, 16),
         dict(tile_q=128, tile_k=128)),                      # C/8 contraction path
    ]

    subkeys = jax.random.split(key, len(cases))
    for (name, (B, C, W, H), kwargs), sk in zip(cases, subkeys):
        args = make_inputs(sk, B, C, W, H)
        run = jax.jit(functools.partial(self_attn_pallas, **kwargs))
        out = jax.block_until_ready(run(*args))
        ref = self_attn_reference(*args)
        assert out.shape == (B, C, W, H), name
        assert jnp.allclose(out, ref, atol=1e-4, rtol=1e-4), f"mismatch: {name}"

    print("KERNEL_OK")
</pallas_src>

<mosaic_0001>
module attributes {stable_mosaic.version = 11 : i64} {
  func.func @_self_attn_flash_kernel(%arg0: i32, %arg1: i32, %arg2: i32, %arg3: memref<1x32x128xf32, #tpu.memory_space<vmem>>, %arg4: memref<1x32x128xf32, #tpu.memory_space<vmem>>, %arg5: memref<1x32x256xf32, #tpu.memory_space<vmem>>, %arg6: memref<1x33x256xf32, #tpu.memory_space<vmem>>, %arg7: memref<1x32x128xf32, #tpu.memory_space<vmem>>, %arg8: memref<1x128xf32, #tpu.memory_space<vmem>>, %arg9: memref<33x128xf32, #tpu.memory_space<vmem>>) attributes {dimension_semantics = [#tpu.dimension_semantics<parallel>, #tpu.dimension_semantics<parallel>, #tpu.dimension_semantics<arbitrary>], iteration_bounds = array<i64: 2, 2, 2>, scalar_prefetch = 0 : i64, scratch_operands = 2 : i64, tpu.core_type = #tpu.core_type<tc>, window_params = [{transform_indices = @transform_0, window_bounds = array<i64: 1, 32, 128>}, {transform_indices = @transform_1, window_bounds = array<i64: 1, 32, 128>}, {transform_indices = @transform_2, window_bounds = array<i64: 1, 32, 256>}, {transform_indices = @transform_3, window_bounds = array<i64: 1, 33, 256>}, {transform_indices = @transform_4, window_bounds = array<i64: 1, 32, 128>}]} {
    %c0_i32 = arith.constant 0 : i32
    %0 = arith.cmpi eq, %arg2, %c0_i32 : i32
    %1 = arith.extui %0 : i1 to i32
    %c0_i32_0 = arith.constant 0 : i32
    %2 = arith.cmpi ne, %1, %c0_i32_0 : i32
    scf.if %2 {
      %cst_18 = arith.constant 0xFF800000 : f32
      %33 = vector.broadcast %cst_18 : f32 to vector<1x128xf32>
      %c0_19 = arith.constant 0 : index
      %c0_20 = arith.constant 0 : index
      %34 = vector.load %arg8[%c0_19, %c0_20] : memref<1x128xf32, #tpu.memory_space<vmem>>, vector<1x128xf32>
      tpu.vector_store %arg8[%c0_19, %c0_20], %33 {strides = array<i32>} : memref<1x128xf32, #tpu.memory_space<vmem>>, vector<1x128xf32>,
      %cst_21 = arith.constant 0.000000e+00 : f32
      %35 = vector.broadcast %cst_21 : f32 to vector<33x128xf32>
      %c0_22 = arith.constant 0 : index
      %c0_23 = arith.constant 0 : index
      %36 = vector.load %arg9[%c0_22, %c0_23] : memref<33x128xf32, #tpu.memory_space<vmem>>, vector<33x128xf32>
      tpu.vector_store %arg9[%c0_22, %c0_23], %35 {strides = array<i32>} : memref<33x128xf32, #tpu.memory_space<vmem>>, vector<33x128xf32>,
    } else {
    }
    %c128_i32 = arith.constant 128 : i32
    %3 = arith.muli %arg2, %c128_i32 : i32
    %4 = tpu.assume_multiple %3, 128 : i32
    %c0 = arith.constant 0 : index
    %c0_1 = arith.constant 0 : index
    %5 = arith.index_cast %4 : i32 to index
    %6 = vector.load %arg5[%c0, %c0_1, %5] : memref<1x32x256xf32, #tpu.memory_space<vmem>>, vector<1x32x128xf32>
    %7 = vector.shape_cast %6 : vector<1x32x128xf32> to vector<32x128xf32>
    %c0_2 = arith.constant 0 : index
    %c0_3 = arith.constant 0 : index
    %8 = arith.index_cast %4 : i32 to index
    %9 = vector.load %arg6[%c0_2, %c0_3, %8] : memref<1x33x256xf32, #tpu.memory_space<vmem>>, vector<1x33x128xf32>
    %10 = vector.shape_cast %9 : vector<1x33x128xf32> to vector<33x128xf32>
    %c0_4 = arith.constant 0 : index
    %c0_5 = arith.constant 0 : index
    %c0_6 = arith.constant 0 : index
    %11 = vector.load %arg3[%c0_4, %c0_5, %c0_6] : memref<1x32x128xf32, #tpu.memory_space<vmem>>, vector<1x32x128xf32>
    %12 = vector.shape_cast %11 : vector<1x32x128xf32> to vector<32x128xf32>
    %cst = arith.constant dense<0.000000e+00> : vector<128x128xf32>
    %13 = tpu.matmul %7, %12, %cst {dimension_numbers = #tpu.dot_dimension_numbers<[0], [0], [1], [1], [0, 1, 1, 1], [], []>} : vector<32x128xf32>, vector<32x128xf32>, vector<128x128xf32> -> vector<128x128xf32>
    %c0_7 = arith.constant 0 : index
    %c0_8 = arith.constant 0 : index
    %14 = vector.load %arg8[%c0_7, %c0_8] : memref<1x128xf32, #tpu.memory_space<vmem>>, vector<1x128xf32>
    %cst_9 = arith.constant dense<0xFF800000> : vector<128xf32>
    %15 = vector.multi_reduction <maximumf>, %13, %cst_9 [0] : vector<128x128xf32> to vector<128xf32>
    %16 = vector.shape_cast %15 : vector<128xf32> to vector<1x128xf32>
    %17 = arith.maximumf %14, %16 : vector<1x128xf32>
    %18 = arith.subf %14, %17 : vector<1x128xf32>
    %19 = math.exp %18 : vector<1x128xf32>
    %20 = vector.broadcast %17 : vector<1x128xf32> to vector<128x128xf32>
    %21 = arith.subf %13, %20 : vector<128x128xf32>
    %22 = math.exp %21 : vector<128x128xf32>
    %c0_10 = arith.constant 0 : index
    %c0_11 = arith.constant 0 : index
    %23 = vector.load %arg8[%c0_10, %c0_11] : memref<1x128xf32, #tpu.memory_space<vmem>>, vector<1x128xf32>
    tpu.vector_store %arg8[%c0_10, %c0_11], %17 {strides = array<i32>} : memref<1x128xf32, #tpu.memory_space<vmem>>, vector<1x128xf32>,
    %c0_12 = arith.constant 0 : index
    %c0_13 = arith.constant 0 : index
    %24 = vector.load %arg9[%c0_12, %c0_13] : memref<33x128xf32, #tpu.memory_space<vmem>>, vector<33x128xf32>
    %25 = vector.broadcast %19 : vector<1x128xf32> to vector<33x128xf32>
    %26 = arith.mulf %25, %24 : vector<33x128xf32>
    %cst_14 = arith.constant dense<0.000000e+00> : vector<33x128xf32>
    %27 = tpu.matmul %10, %22, %cst_14 {dimension_numbers = #tpu.dot_dimension_numbers<[1], [0], [0], [1], [0, 0, 1, 1], [], []>} : vector<33x128xf32>, vector<128x128xf32>, vector<33x128xf32> -> vector<33x128xf32>
    %28 = arith.addf %26, %27 : vector<33x128xf32>
    %c0_15 = arith.constant 0 : index
    %c0_16 = arith.constant 0 : index
    %29 = vector.load %arg9[%c0_15, %c0_16] : memref<33x128xf32, #tpu.memory_space<vmem>>, vector<33x128xf32>
    tpu.vector_store %arg9[%c0_15, %c0_16], %28 {strides = array<i32>} : memref<33x128xf32, #tpu.memory_space<vmem>>, vector<33x128xf32>,
    %c1_i32 = arith.constant 1 : i32
    %30 = arith.cmpi eq, %arg2, %c1_i32 : i32
    %31 = arith.extui %30 : i1 to i32
    %c0_i32_17 = arith.constant 0 : i32
    %32 = arith.cmpi ne, %31, %c0_i32_17 : i32
    scf.if %32 {
      %c32 = arith.constant 32 : index
      %c0_18 = arith.constant 0 : index
      %33 = vector.load %arg9[%c32, %c0_18] : memref<33x128xf32, #tpu.memory_space<vmem>>, vector<1x128xf32>
      %34 = tpu.reciprocal %33 : vector<1x128xf32> -> vector<1x128xf32>
      %c0_19 = arith.constant 0 : index
      %c0_20 = arith.constant 0 : index
      %35 = vector.load %arg9[%c0_19, %c0_20] : memref<33x128xf32, #tpu.memory_space<vmem>>, vector<32x128xf32>
      %36 = vector.broadcast %34 : vector<1x128xf32> to vector<32x128xf32>
      %37 = arith.mulf %35, %36 : vector<32x128xf32>
      %c0_21 = arith.constant 0 : index
      %c0_22 = arith.constant 0 : index
      %c0_23 = arith.constant 0 : index
      %38 = vector.load %arg4[%c0_21, %c0_22, %c0_23] : memref<1x32x128xf32, #tpu.memory_space<vmem>>, vector<1x32x128xf32>
      %39 = vector.shape_cast %38 : vector<1x32x128xf32> to vector<32x128xf32>
      %40 = arith.addf %37, %39 : vector<32x128xf32>
      %c0_24 = arith.constant 0 : index
      %c0_25 = arith.constant 0 : index
      %c0_26 = arith.constant 0 : index
      %41 = vector.load %arg7[%c0_24, %c0_25, %c0_26] : memref<1x32x128xf32, #tpu.memory_space<vmem>>, vector<1x32x128xf32>
      %42 = vector.shape_cast %41 : vector<1x32x128xf32> to vector<32x128xf32>
      %43 = vector.shape_cast %40 : vector<32x128xf32> to vector<1x32x128xf32>
      tpu.vector_store %arg7[%c0_24, %c0_25, %c0_26], %43 {strides = array<i32>} : memref<1x32x128xf32, #tpu.memory_space<vmem>>, vector<1x32x128xf32>,
    } else {
    }
    return
  }
  func.func @transform_0(%arg0: i32, %arg1: i32, %arg2: i32) -> (i32, i32, i32) {
    %c0_i32 = arith.constant 0 : i32
    %c0_i32_0 = arith.constant 0 : i32
    return %arg0, %c0_i32, %arg1 : i32, i32, i32
  }
  func.func @transform_1(%arg0: i32, %arg1: i32, %arg2: i32) -> (i32, i32, i32) {
    %c0_i32 = arith.constant 0 : i32
    %c0_i32_0 = arith.constant 0 : i32
    return %arg0, %c0_i32, %arg1 : i32, i32, i32
  }
  func.func @transform_2(%arg0: i32, %arg1: i32, %arg2: i32) -> (i32, i32, i32) {
    %c0_i32 = arith.constant 0 : i32
    %c0_i32_0 = arith.constant 0 : i32
    %c0_i32_1 = arith.constant 0 : i32
    return %arg0, %c0_i32, %c0_i32_0 : i32, i32, i32
  }
  func.func @transform_3(%arg0: i32, %arg1: i32, %arg2: i32) -> (i32, i32, i32) {
    %c0_i32 = arith.constant 0 : i32
    %c0_i32_0 = arith.constant 0 : i32
    %c0_i32_1 = arith.constant 0 : i32
    return %arg0, %c0_i32, %c0_i32_0 : i32, i32, i32
  }
  func.func @transform_4(%arg0: i32, %arg1: i32, %arg2: i32) -> (i32, i32, i32) {
    %c0_i32 = arith.constant 0 : i32
    %c0_i32_0 = arith.constant 0 : i32
    return %arg0, %c0_i32, %arg1 : i32, i32, i32
  }
}

</mosaic_0001>

<bundles_post_ra>
// kernel: self_attn_pallas.1
= control target key start
LH: loop header
LB: loop body
LE: loop exit
PB: predicated region body
PF: predicated region fallthrough
CT: control target
= control target key end

     0   :  { %s1722_s0 = inlined_call_operand.vmem [shape: f32[2,32,256], index: 0, kind: input, shape index: {}]   ;;  %s1723_s1 = inlined_call_operand.vmem [shape: f32[2,32,256], index: 1, kind: input, shape index: {}, may-alias: {1,2}]   ;;  %s1724_s2 = inlined_call_operand.vmem [shape: f32[2,32,256], index: 2, kind: input, shape index: {}, may-alias: {1,2}]   ;;  %s1725_s3 = inlined_call_operand.vmem [shape: f32[2,33,256], index: 3, kind: input, shape index: {}]   ;;  %s1726_s4 = inlined_call_operand.vmem [shape: f32[2,32,256], index: 4, kind: output, shape index: {}]  }
   0x1   :  { %1727 = sst [smem:[#allocation7_spill]] %s1722_s0 }
   0x2   :  { %1728 = sst [smem:[#allocation8_spill]] %s1723_s1 }
   0x3   :  { %s1465_s15 = smov 0   ;;  %s1467_s16 = smov 0  }
   0x4   :  { %s1469_s17 = smov 0   ;;  %s1471_s18 = smov 0  }
   0x5   :  { %s1473_s19 = smov 0   ;;  %s1475_s20 = smov 0  }
   0x6   :  { %s1477_s21 = smov 0   ;;  %s1479_s22 = smov 0  }
   0x7   :  { %s1481_s23 = smov 0  }
   0x8 LB: > { %s26_s24 = sadd.s32 1, %s1421_s20  ;;  %s29_s25 = sadd.s32 1, %s1425_s21  ;;  %s1433_s23 = sphi %s1481_s23, %s14_s23   ;;  %s1429_s22 = sphi %s1479_s22, %s1740_s22   ;;  %s1425_s21 = sphi %s1477_s21, %s1739_s21   ;;  %s1421_s20 = sphi %s1475_s20, %s1738_s20   ;;  %s1417_s19 = sphi %s1473_s19, %s1737_s19   ;;  %s1413_s18 = sphi %s1471_s18, %s1736_s18   ;;  %s1409_s17 = sphi %s1469_s17, %s1735_s17   ;;  %s1405_s16 = sphi %s1467_s16, %s1734_s16   ;;  %s1401_s15 = sphi %s1465_s15, %s1733_s15  }
   0x9   : > { %p27_p0 = scmp.ge.s32.totalorder %s26_s24, 2  ;;  %s1037_s26 = sadd.s32 4294967295, %s1433_s23  }
   0xa   : > { %s33_s27 = sadd.s32 1, %s1429_s22  ;;  %p49_p1 = scmp.ne.s32.totalorder %s1405_s16, %s1401_s15 }
   0xb   : > { %s1742_s24 = smov (%p27_p0, %s26_s24), 0  ;;  %s1744_s25 = smov (!%p27_p0, %s29_s25), %s1425_s21 }
   0xc   : > { %p50_p2 = scmp.eq.s32.totalorder %s1433_s23, 0  ;;  %p31_p3 = scmp.ge.s32.totalorder %s1744_s25, 2 }
   0xd   : > { %p161_p4 = scmp.eq.s32.totalorder %s1037_s26, 7  ;;  %s42_s7 = sadd.s32 1, %s1405_s16 }
   0xe   : > { %p1520_p5 = por %p50_p2, %p49_p1  ;;  %s1746_s25 = smov (%p31_p3, %s1744_s25), 0 }
   0xf   : > { %s1748_s27 = smov (!%p31_p3, %s33_s27), %s1429_s22  ;;  %p1527_p6 = por %p161_p4, %p49_p1 }
  0x10   : > { %p35_p7 = scmp.ge.s32.totalorder %s1748_s27, 2  ;;  %s38_s30 = ssub.s32 %s1425_s21, %s1746_s25 }
  0x11   : > { %p1040_p9 = scmp.ge.s32.totalorder %s1433_s23, 8 }
  0x12   : > { %s1750_s27 = smov (%p35_p7, %s1748_s27), 0 }
  0x13   : > { %s37_s5 = ssub.s32 %s1429_s22, %s1750_s27  ;;  %183 = sbr.rel (%p1040_p9) target bundleno = 50 (0x32), region = 16 }
  0x14   : > { %s39_s6 = sor.u32 %s38_s30, %s37_s5 }
  0x15   : > { %p40_p8 = scmp.eq.s32.totalorder %s39_s6, 0 }
  0x17   : > { %s1539_s8 = scalar_select %p40_p8, %s1405_s16, %s42_s7  }
  0x1a   : > { %186 = sbr.rel (!%p1520_p5) target bundleno = 38 (0x26), region = 20  ;;  %s188_s9 = sand.u32 (%p1520_p5), 1, %s1405_s16  }
  0x1b   : > { %s1042_s10 = sshll.u32 (%p1520_p5), %s1429_s22, 3  ;;  %s1041_s11 = sshll.u32 (%p1520_p5), %s188_s9, 5 }
  0x1c   : > { %s192_s12 = sadd.s32 (%p1520_p5), %s1425_s21, %s1042_s10  ;;  %s1731_s0 = sld [smem:[#allocation7_spill]] (%p1520_p5) }
  0x1d   : > { %s1043_s13 = sshll.u32 (%p1520_p5), %s192_s12, 3  ;;  %s190_s5 = scalar_lea.vmem (%p1520_p5), [#allocation4], %s1041_s11 }
  0x22   : > { %s194_s30 = scalar_lea.vmem %s1731_s0, %s1043_s13 }
  0x23   : > { %v228_v0 = vld [vmem:[%s194_s30] sm:$0xff]  ;;  %v230_v1 = vld [vmem:[%s194_s30 + $0x10] sm:$0xff] }
  0x24   : > { %v232_v2 = vld [vmem:[%s194_s30 + $0x20] sm:$0xff]  ;;  %229 = vst [vmem:[%s190_s5] sm:$0xff] %v228_v0  ;;  %231 = vst [vmem:[%s190_s5 + $0x8] sm:$0xff] %v230_v1  ;;  %v234_v3 = vld [vmem:[%s194_s30 + $0x30] sm:$0xff] }
  0x25   : > { %233 = vst [vmem:[%s190_s5 + $0x10] sm:$0xff] %v232_v2  ;;  %235 = vst [vmem:[%s190_s5 + $0x18] sm:$0xff] %v234_v3 }
  0x26 PF: > { %241 = sbr.rel (!%p1520_p5) target bundleno = 50 (0x32), region = 58  ;;  %s243_s6 = sand.u32 (%p1520_p5), 1, %s1405_s16  }
  0x27   : > { %s1045_s7 = sshll.u32 (%p1520_p5), %s1429_s22, 3  ;;  %s1044_s9 = sshll.u32 (%p1520_p5), %s243_s6, 5 }
  0x28   : > { %s247_s10 = sadd.s32 (%p1520_p5), %s1425_s21, %s1045_s7  ;;  %s1732_s1 = sld [smem:[#allocation8_spill]] (%p1520_p5) }
  0x29   : > { %s1046_s12 = sshll.u32 (%p1520_p5), %s247_s10, 3  ;;  %s245_s26 = scalar_lea.vmem (%p1520_p5), [#allocation5], %s1044_s9 }
  0x2e   : > { %s249_s11 = scalar_lea.vmem %s1732_s1, %s1046_s12 }
  0x2f   : > { %v283_v4 = vld [vmem:[%s249_s11] sm:$0xff]  ;;  %v285_v5 = vld [vmem:[%s249_s11 + $0x10] sm:$0xff] }
  0x30   : > { %v287_v6 = vld [vmem:[%s249_s11 + $0x20] sm:$0xff]  ;;  %284 = vst [vmem:[%s245_s26] sm:$0xff] %v283_v4  ;;  %286 = vst [vmem:[%s245_s26 + $0x8] sm:$0xff] %v285_v5  ;;  %v289_v7 = vld [vmem:[%s249_s11 + $0x30] sm:$0xff] }
  0x31   : > { %288 = vst [vmem:[%s245_s26 + $0x10] sm:$0xff] %v287_v6  ;;  %290 = vst [vmem:[%s245_s26 + $0x18] sm:$0xff] %v289_v7 }
  0x32 PF: > { %p1047_p10 = scmp.ge.s32.totalorder %s1433_s23, 1  ;;  %p311_p11 = scmp.lt.s32.totalorder %s1433_s23, 9 }
  0x34   : > { %p312_p12 = pnand %p1047_p10, %p311_p11 }
  0x35   : > { %s318_s28 = sand.u32 (!%p312_p12), 1, %s1401_s15   ;;  %p363_p13 = scmp.lt.s32.totalorder (!%p312_p12), %s1417_s19, 1 }
  0x36   : > { %315 = sbr.rel (%p312_p12) target bundleno = 809 (0x329), region = 104  ;;  %s1048_s30 = sshll.u32 (!%p312_p12), %s318_s28, 5 }
  0x37   : > { %s320_s26 = scalar_lea.vmem (!%p312_p12), [#allocation4], %s1048_s30  ;;  %s1571_s0 = scalar_lea.vmem (!%p312_p12), [#allocation5], %s1048_s30 }
  0x38   : > { %s1573_s1 = scalar_lea.vmem (!%p312_p12), [#allocation6], %s1048_s30  ;;  %p1054_p0 = scmp.ne.s32.totalorder (!%p312_p12), %s1409_s17, 0 }
  0x3d   : > { %s364_s5 = scalar_select %p363_p13, %s1417_s19, 1 }
  0x3e   : > { %376 = sbr.rel (%p1054_p0) target bundleno = 69 (0x45), region = 116  ;;  %v1435_v8 = vmov (!%p1054_p0), -inf   ;;  %v1436_v9 = vmov (!%p1054_p0), 0.0  }
  0x3f   : > { %s1080_s6 = sshll.u32 %s364_s5, 6  ;;  %s1249_s7 = smul.u32 80, %s364_s5  ;;  %377 = vst [vmem:[#allocation2] sm:$0x1] (!%p1054_p0), %v1435_v8  ;;  %378 = vst [vmem:[#allocation3] sm:$0xff] (!%p1054_p0), %v1436_v9 }
  0x40   : > { %s367_s12 = scalar_lea.vmem %s1724_s2, %s1080_s6  ;;  %379 = vst [vmem:[#allocation3 + $0x8] sm:$0xff] (!%p1054_p0), %v1436_v9  ;;  %380 = vst [vmem:[#allocation3 + $0x10] sm:$0xff] (!%p1054_p0), %v1436_v9 }
  0x41   : > { %s1569_s11 = scalar_lea.vmem %s1725_s3, %s1249_s7  ;;  %381 = vst [vmem:[#allocation3 + $0x18] sm:$0xff] (!%p1054_p0), %v1436_v9  ;;  %382 = vst [vmem:[#allocation3 + $0x20] sm:$0x1] (!%p1054_p0), %v1436_v9 }
  0x45 PF: > { %s1055_s15 = sshll.u32 %s1409_s17, 7  ;;  %v399_v10 = vld [vmem:[%s320_s26] sm:$0xff]  ;;  %v400_v11 = vld [vmem:[%s320_s26 + $0x8] sm:$0xff]  ;;  %v401_v13 = vld [vmem:[%s320_s26 + $0x10] sm:$0xff]  ;;  %vm435_vm0 = vcmask 261120   ;;  %v1437_v36 = vmov 0.0|0.0   ;;  %v656_v7 = vlaneseq }
  0x46   : > { %s1577_s28 = sshra.s32 %s1055_s15, 7  ;;  %v1201_v12 = vpack.c.bf16 %v400_v11, %v399_v10  ;;  %v402_v14 = vld [vmem:[%s320_s26 + $0x18] sm:$0xff]  ;;  %1233 = vmatprep.subr.bf16.mxu1 %v1437_v36  ;;  %vm1438_vm1 = vmmov 0   ;;  %v1439_v38 = vmov 0.0   ;;  %p1074_p1 = scmp.ne.s32.totalorder %s1409_s17, 1 }
  0x47   : > { %s1056_s30 = sshll.u32 %s1577_s28, 3  ;;  %v1205_v16 = vpack.c.bf16 %v402_v14, %v401_v13  ;;  %1189 = vmatprep.mubr.msk.f32.mxu1 %vm1438_vm1, %v1439_v38  ;;  %v657_v10 = vshrl.u32 %v656_v7, 7 }
  0x48   : > { %s387_s5 = scalar_lea.vmem %s367_s12, %s1056_s30  ;;  %1202 = vmatprep.subr.bf16.mxu0 %v1201_v12  ;;  %s393_s6 = scalar_lea.vmem %s1569_s11, %s1056_s30 }
  0x49   : > { %v388_v15 = vld [vmem:[%s387_s5] sm:$0xff]  ;;  %1204 = vmatpush3.bf16.msra.mxu0 %v1201_v12  ;;  %v389_v17 = vld [vmem:[%s387_s5 + $0x10] sm:$0xff]  ;;  %v1631_v14 = vsub.s32 0, %v657_v10 }
  0x4a   : > { %403 = vxpose.xlu0.b32.start [1/4] (short) %v388_v15, 128  ;;  %1206 = vmatprep.subr.bf16.mxu0 %v1205_v16  ;;  %v390_v18 = vld [vmem:[%s387_s5 + $0x20] sm:$0xff]  ;;  %v391_v19 = vld [vmem:[%s387_s5 + $0x30] sm:$0xff] }
  0x4b   : > { %v629_v12 = vld [vmem:[#allocation2] sm:$0x1] }
  0x4d   : > { %1208 = vmatpush3.bf16.msra.mxu0 %v1205_v16 }
  0x4e   : > { %404 = vxpose.xlu0.b32.cont [2/4] (short) %v389_v17, 128  ;;  %1209 = vmatprep.subr.bf16.mxu0 %v1437_v36 }
  0x52   : > { %405 = vxpose.xlu0.b32.cont [3/4] (short) %v390_v18, 128 }
  0x56   : > { %406 = vxpose.xlu0.b32.end [4/4] (short) %v391_v19, 128 }
  0xca   : > { %v419_v20 = vpop.trf.xlu0 }
  0xcb   : > { %1130 = vmatprep.mubr.msk.f32.mxu0 %vm435_vm0, %v419_v20 }
  0xce   : > { %v420_v21 = vpop.trf.xlu0 }
  0xcf   : > { %1131 = vmatmul.mubr.msk.f32.vlgmr.msra.gmra.mrb[0].mxu0 %vm435_vm0, %v420_v21 }
  0xd2   : > { %v421_v22 = vpop.trf.xlu0 }
  0xd3   : > { %1133 = vmatprep.mubr.msk.f32.mxu0 %vm435_vm0, %v421_v22 }
  0xd6   : > { %v422_v23 = vpop.trf.xlu0 }
  0xd7   : > { %1134 = vmatmul.mubr.msk.f32.gmra.mrb[2].mxu0 %vm435_vm0, %v422_v23 }
  0xda   : > { %v423_v24 = vpop.trf.xlu0 }
  0xdb   : > { %1136 = vmatprep.mubr.msk.f32.mxu0 %vm435_vm0, %v423_v24 }
  0xde   : > { %v424_v25 = vpop.trf.xlu0 }
  0xdf   : > { %1137 = vmatmul.mubr.msk.f32.gmra.mrb[4].mxu0 %vm435_vm0, %v424_v25 }
  0xe2   : > { %v425_v26 = vpop.trf.xlu0 }
  0xe3   : > { %1139 = vmatprep.mubr.msk.f32.mxu0 %vm435_vm0, %v425_v26 }
  0xe6   : > { %v426_v27 = vpop.trf.xlu0 }
  0xe7   : > { %1140 = vmatmul.mubr.msk.f32.gmra.mrb[6].mxu0 %vm435_vm0, %v426_v27 }
  0xea   : > { %v427_v28 = vpop.trf.xlu0 }
  0xeb   : > { %1142 = vmatprep.mubr.msk.f32.mxu0 %vm435_vm0, %v427_v28 }
  0xee   : > { %v428_v29 = vpop.trf.xlu0 }
  0xef   : > { %1143 = vmatmul.mubr.msk.f32.gmra.mrb[8].mxu0 %vm435_vm0, %v428_v29 }
  0xf2   : > { %v429_v30 = vpop.trf.xlu0 }
  0xf3   : > { %1145 = vmatprep.mubr.msk.f32.mxu0 %vm435_vm0, %v429_v30 }
  0xf6   : > { %v430_v31 = vpop.trf.xlu0 }
  0xf7   : > { %1146 = vmatmul.mubr.msk.f32.gmra.mrb[10].mxu0 %vm435_vm0, %v430_v31 }
  0xfa   : > { %v431_v32 = vpop.trf.xlu0 }
  0xfb   : > { %1148 = vmatprep.mubr.msk.f32.mxu0 %vm435_vm0, %v431_v32 }
  0xfe   : > { %v432_v33 = vpop.trf.xlu0 }
  0xff   : > { %1149 = vmatmul.mubr.msk.f32.gmra.mrb[12].mxu0 %vm435_vm0, %v432_v33 }
 0x102   : > { %v433_v34 = vpop.trf.xlu0 }
 0x103   : > { %1151 = vmatprep.mubr.msk.f32.mxu0 %vm435_vm0, %v433_v34 }
 0x106   : > { %v434_v35 = vpop.trf.xlu0 }
 0x107   : > { %1152 = vmatmul.mubr.msk.f32.gmra.mrb[14].mxu0 %vm435_vm0, %v434_v35 }
 0x108   : > { %1186 = vmatprep.mubr.msk.f32.mxu0 %vm1438_vm1, %v1439_v38 }
 0x1a2   : > { %v1132_v37 = vpop.f32.mrb[0].mxu0 }
 0x1a3   : > { %v550_v39 = vpop.f32.mrb[1].mxu0 }
 0x1aa   : > { %v1135_v40 = vpop.f32.mrb[2].mxu0 }
 0x1ab   : > { %v560_v41 = vpop.f32.mrb[3].mxu0 }
 0x1b2   : > { %v1604_v42 = vpop.f32.mrb[4].mxu0 }
 0x1b3   : > { %v631_v43 = vmax.f32 %v1132_v37, %v1604_v42  ;;  %v570_v44 = vpop.f32.mrb[5].mxu0 }
 0x1b4   : > { %v630_v45 = vmax.f32 %v550_v39, %v570_v44 }
 0x1ba   : > { %v1607_v46 = vpop.f32.mrb[6].mxu0 }
 0x1bb   : > { %v633_v47 = vmax.f32 %v1135_v40, %v1607_v46  ;;  %v580_v48 = vpop.f32.mrb[7].mxu0 }
 0x1bc   : > { %v632_v49 = vmax.f32 %v560_v41, %v580_v48 }
 0x1c2   : > { %v1610_v50 = vpop.f32.mrb[8].mxu0 }
 0x1c3   : > { %v635_v51 = vmax.f32 %v631_v43, %v1610_v50  ;;  %v1613_v52 = vpop.f32.mrb[9].mxu0 }
 0x1c4   : > { %v634_v53 = vmax.f32 %v630_v45, %v1613_v52 }
 0x1ca   : > { %v1616_v54 = vpop.f32.mrb[10].mxu0 }
 0x1cb   : > { %v637_v55 = vmax.f32 %v633_v47, %v1616_v54  ;;  %v1619_v56 = vpop.f32.mrb[11].mxu0 }
 0x1cc   : > { %v636_v57 = vmax.f32 %v632_v49, %v1619_v56 }
 0x1d2   : > { %v1622_v58 = vpop.f32.mrb[12].mxu0 }
 0x1d3   : > { %v639_v59 = vmax.f32 %v635_v51, %v1622_v58  ;;  %v1625_v60 = vpop.f32.mrb[13].mxu0 }
 0x1d4   : > { %v638_v61 = vmax.f32 %v634_v53, %v1625_v60 }
 0x1d6   : > { %v642_v62 = vmax.f32 %v638_v61, %v639_v59 }
 0x1da   : > { %v1628_v63 = vpop.f32.mrb[14].mxu0 }
 0x1db   : > { %v641_v0 = vmax.f32 %v637_v55, %v1628_v63  ;;  %v620_v1 = vpop.f32.mrb[15].mxu0 }
 0x1dc   : > { %v640_v2 = vmax.f32 %v636_v57, %v620_v1 }
 0x1de   : > { %v643_v3 = vmax.f32 %v640_v2, %v641_v0 }
 0x1e0   : > { %v644_v4 = vmax.f32 %v642_v62, %v643_v3 }
 0x1e2   : > { %v645_v5 = vrot.slane %v644_v4, 4 }
 0x1e4   : > { %v646_v6 = vmax.f32 %v644_v4, %v645_v5 }
 0x1e6   : > { %v647_v8 = vrot.slane %v646_v6, 2 }
 0x1e8   : > { %v648_v9 = vmax.f32 %v646_v6, %v647_v8 }
 0x1ea   : > { %v649_v11 = vrot.slane %v648_v9, 1 }
 0x1ec   : > { %v650_v13 = vmax.f32 %v648_v9, %v649_v11 }
 0x1ee   : > { %v651_v15 = vmax.f32 %v629_v12, %v650_v13 }
 0x1f0   : > { %v652_v16 = vsub.f32 %v629_v12, %v651_v15  ;;  %v659_v17 = vrot.slane %v651_v15, %v1631_v14  ;;  %709 = vst [vmem:[#allocation2] sm:$0x1] %v651_v15 }
 0x1f2   : > { %v653_v18 = vmul.f32 1.442695, %v652_v16  ;;  %v675_v19 = vsub.f32 %v620_v1, %v659_v17  ;;  %v661_v20 = vsub.f32 %v550_v39, %v659_v17  ;;  %v662_v21 = vsub.f32 %v1132_v37, %v659_v17  ;;  %v394_v16 = vld [vmem:[%s393_s6] sm:$0xff] }
 0x1f3   : > { %v663_v22 = vsub.f32 %v560_v41, %v659_v17  ;;  %v664_v23 = vsub.f32 %v1135_v40, %v659_v17  ;;  %v665_v24 = vsub.f32 %v570_v44, %v659_v17  ;;  %v666_v25 = vsub.f32 %v1604_v42, %v659_v17 }
 0x1f4   : > { %1327 = vpow2.f32 %v653_v18  ;;  %v705_v26 = vmul.f32 1.442695, %v675_v19  ;;  %v677_v27 = vmul.f32 1.442695, %v661_v20  ;;  %v679_v28 = vmul.f32 1.442695, %v662_v21 }
 0x1f5   : > { %v681_v29 = vmul.f32 1.442695, %v663_v22  ;;  %v667_v30 = vsub.f32 %v580_v48, %v659_v17  ;;  %v683_v31 = vmul.f32 1.442695, %v664_v23  ;;  %v668_v32 = vsub.f32 %v1607_v46, %v659_v17  ;;  %v396_v18 = vld [vmem:[%s393_s6 + $0x20] sm:$0xff]  ;;  %v397_v19 = vld [vmem:[%s393_s6 + $0x30] sm:$0xff] }
 0x1f6   : > { %1329 = vpow2.f32 %v705_v26  ;;  %v669_v33 = vsub.f32 %v1613_v52, %v659_v17  ;;  %v685_v34 = vmul.f32 1.442695, %v665_v24  ;;  %v670_v35 = vsub.f32 %v1610_v50, %v659_v17  ;;  %v710_v20 = vld [vmem:[#allocation3] sm:$0xff]  ;;  %v711_v21 = vld [vmem:[#allocation3 + $0x8] sm:$0xff]  ;;  %v712_v26 = vld [vmem:[#allocation3 + $0x10] sm:$0xff] }
 0x1f7   : > { %1331 = vpow2.f32 %v677_v27  ;;  %v671_v37 = vsub.f32 %v1619_v56, %v659_v17  ;;  %v687_v39 = vmul.f32 1.442695, %v666_v25  ;;  %v672_v40 = vsub.f32 %v1616_v54, %v659_v17 }
 0x1f8   : > { %1333 = vpow2.f32 %v679_v28  ;;  %v689_v41 = vmul.f32 1.442695, %v667_v30  ;;  %v673_v42 = vsub.f32 %v1625_v60, %v659_v17  ;;  %v691_v43 = vmul.f32 1.442695, %v668_v32  ;;  %v713_v32 = vld [vmem:[#allocation3 + $0x18] sm:$0xff] }
 0x1f9   : > { %1335 = vpow2.f32 %v681_v29  ;;  %v674_v44 = vsub.f32 %v1622_v58, %v659_v17  ;;  %v676_v45 = vsub.f32 %v1628_v63, %v659_v17  ;;  %v693_v46 = vmul.f32 1.442695, %v669_v33  ;;  %v395_v17 = vld [vmem:[%s393_s6 + $0x10] sm:$0xff] }
 0x1fa   : > { %1337 = vpow2.f32 %v683_v31  ;;  %v695_v47 = vmul.f32 1.442695, %v670_v35  ;;  %v697_v48 = vmul.f32 1.442695, %v671_v37  ;;  %v699_v50 = vmul.f32 1.442695, %v672_v40 }
 0x1fb   : > { %1339 = vpow2.f32 %v685_v34  ;;  %v701_v51 = vmul.f32 1.442695, %v673_v42  ;;  %v703_v54 = vmul.f32 1.442695, %v674_v44  ;;  %v707_v56 = vmul.f32 1.442695, %v676_v45 }
 0x1fc   : > { %1341 = vpow2.f32 %v687_v39  ;;  %v714_v39 = vld [vmem:[#allocation3 + $0x20] sm:$0x1] }
 0x1fd   : > { %1343 = vpow2.f32 %v689_v41 }
 0x1fe   : > { %v1328_v49 = vpop.eup %1327  ;;  %1345 = vpow2.f32 %v691_v43 }
 0x1ff   : > { %1347 = vpow2.f32 %v693_v46  ;;  %v1644_v52 = vrot.slane %v1328_v49, %v1631_v14 }
 0x200   : > { %v1330_v53 = vpop.eup %1329  ;;  %1349 = vpow2.f32 %v695_v47 }
 0x201   : > { %v1332_v55 = vpop.eup %1331  ;;  %1351 = vpow2.f32 %v697_v48  ;;  %v721_v22 = vmul.f32 %v1644_v52, %v710_v20  ;;  %v722_v23 = vmul.f32 %v1644_v52, %v711_v21  ;;  %v723_v31 = vmul.f32 %v1644_v52, %v712_v26 }
 0x202   : > { %v1334_v57 = vpop.eup %1333  ;;  %1353 = vpow2.f32 %v699_v50  ;;  %v724_v35 = vmul.f32 %v1644_v52, %v713_v32  ;;  %v725_v42 = vmul.f32 %v1644_v52, %v714_v39 }
 0x203   : > { %v1336_v58 = vpop.eup %1335  ;;  %v1210_v59 = vpack.c.bf16 %v1334_v57, %v1332_v55  ;;  %1355 = vpow2.f32 %v701_v51  ;;  %v846_v55 = vld [vmem:[%s1571_s0 + $0x10] sm:$0xff] (!%p1074_p1) }
 0x204   : > { %v1338_v60 = vpop.eup %1337  ;;  %1357 = vpow2.f32 %v703_v54  ;;  %v845_v54 = vld [vmem:[%s1571_s0 + $0x8] sm:$0xff] (!%p1074_p1) }
 0x205   : > { %v1340_v61 = vpop.eup %1339  ;;  %1211 = vmatpush3.bf16.msra.mxu0 %v1210_v59  ;;  %1241 = vmatpush3.bf16.msra.mxu1 %v1210_v59  ;;  %v1213_v62 = vpack.c.bf16 %v1338_v60, %v1336_v58  ;;  %1359 = vpow2.f32 %v707_v56  ;;  %v847_v56 = vld [vmem:[%s1571_s0 + $0x18] sm:$0xff] (!%p1074_p1) }
 0x206   : > { %v1342_v63 = vpop.eup %1341  ;;  %1212 = vmatprep.subr.bf16.mxu0 %v1437_v36  ;;  %1234 = vmatprep.subr.bf16.mxu1 %v1437_v36 }
 0x207   : > { %v1344_v0 = vpop.eup %1343  ;;  %v1216_v1 = vpack.c.bf16 %v1342_v63, %v1340_v61 }
 0x208   : > { %v1346_v2 = vpop.eup %1345 }
 0x209   : > { %v1348_v3 = vpop.eup %1347  ;;  %1214 = vmatpush3.bf16.msra.mxu0 %v1213_v62  ;;  %1242 = vmatpush3.bf16.msra.mxu1 %v1213_v62  ;;  %v1219_v4 = vpack.c.bf16 %v1346_v2, %v1344_v0 }
 0x20a   : > { %v1350_v5 = vpop.eup %1349  ;;  %1215 = vmatprep.subr.bf16.mxu0 %v1437_v36  ;;  %1235 = vmatprep.subr.bf16.mxu1 %v1437_v36 }
 0x20b   : > { %v1352_v6 = vpop.eup %1351  ;;  %v1222_v7 = vpack.c.bf16 %v1350_v5, %v1348_v3 }
 0x20c   : > { %v1354_v8 = vpop.eup %1353 }
 0x20d   : > { %v1356_v9 = vpop.eup %1355  ;;  %1217 = vmatpush3.bf16.msra.mxu0 %v1216_v1  ;;  %1243 = vmatpush3.bf16.msra.mxu1 %v1216_v1  ;;  %v1225_v10 = vpack.c.bf16 %v1354_v8, %v1352_v6 }
 0x20e   : > { %v1358_v11 = vpop.eup %1357  ;;  %1218 = vmatprep.subr.bf16.mxu0 %v1437_v36  ;;  %1236 = vmatprep.subr.bf16.mxu1 %v1437_v36 }
 0x20f   : > { %v1360_v12 = vpop.eup %1359  ;;  %v1228_v13 = vpack.c.bf16 %v1358_v11, %v1356_v9 }
 0x210   : > { %v1231_v15 = vpack.c.bf16 %v1360_v12, %v1330_v53  ;;  %v844_v53 = vld [vmem:[%s1571_s0] sm:$0xff] (!%p1074_p1) }
 0x211   : > { %1220 = vmatpush3.bf16.msra.mxu0 %v1219_v4  ;;  %1244 = vmatpush3.bf16.msra.mxu1 %v1219_v4 }
 0x212   : > { %1221 = vmatprep.subr.bf16.mxu0 %v1437_v36  ;;  %1237 = vmatprep.subr.bf16.mxu1 %v1437_v36 }
 0x215   : > { %1223 = vmatpush3.bf16.msra.mxu0 %v1222_v7  ;;  %1245 = vmatpush3.bf16.msra.mxu1 %v1222_v7 }
 0x216   : > { %1224 = vmatprep.subr.bf16.mxu0 %v1437_v36  ;;  %1238 = vmatprep.subr.bf16.mxu1 %v1437_v36 }
 0x219   : > { %1226 = vmatpush3.bf16.msra.mxu0 %v1225_v10  ;;  %1246 = vmatpush3.bf16.msra.mxu1 %v1225_v10 }
 0x21a   : > { %1227 = vmatprep.subr.bf16.mxu0 %v1437_v36  ;;  %1239 = vmatprep.subr.bf16.mxu1 %v1437_v36 }
 0x21d   : > { %1229 = vmatpush3.bf16.msra.mxu0 %v1228_v13  ;;  %1247 = vmatpush3.bf16.msra.mxu1 %v1228_v13 }
 0x21e   : > { %1230 = vmatprep.subr.bf16.mxu0 %v1437_v36  ;;  %1240 = vmatprep.subr.bf16.mxu1 %v1437_v36  ;;  %v398_v36 = vld [vmem:[%s393_s6 + $0x40] sm:$0x1] }
 0x221   : > { %1232 = vmatpush3.bf16.msra.mxu0 %v1231_v15  ;;  %1248 = vmatpush3.bf16.msra.mxu1 %v1231_v15 }
 0x224   : > { %1187 = vmatmul.mubr.f32.vlgmr.msra.gmra.mrb[16].mxu0 %v394_v16  ;;  %1190 = vmatmul.mubr.f32.vlgmr.msra.gmra.mrb[0].mxu1 %v395_v17 }
 0x225   : > { %1192 = vmatprep.mubr.msk.f32.mxu1 %vm1438_vm1, %v1439_v38 }
 0x228   : > { %1193 = vmatmul.mubr.f32.gmra.mrb[2].mxu1 %v396_v18 }
 0x229   : > { %1195 = vmatprep.mubr.msk.f32.mxu1 %vm1438_vm1, %v1439_v38 }
 0x22c   : > { %1196 = vmatmul.mubr.f32.gmra.mrb[4].mxu1 %v397_v19 }
 0x22d   : > { %1198 = vmatprep.mubr.msk.f32.mxu1 %vm1438_vm1, %v1439_v38 }
 0x230   : > { %1199 = vmatmul.mubr.f32.gmra.mrb[6].mxu1 %v398_v36 }
 0x2f7   : > { %v792_v24 = vpop.f32.mrb[16].mxu0  ;;  %v797_v25 = vpop.f32.mrb[0].mxu1 }
 0x2f8   : > { %v816_v27 = vadd.f32 %v792_v24, %v721_v22  ;;  %v817_v28 = vadd.f32 %v797_v25, %v722_v23  ;;  %v1191_v29 = vpop.f32.mrb[1].mxu1  ;;  %v1188_v30 = vpop.f32.mrb[17].mxu0 }
 0x2fa   : > { %821 = vst [vmem:[#allocation3] sm:$0xff] %v816_v27  ;;  %822 = vst [vmem:[#allocation3 + $0x8] sm:$0xff] %v817_v28 }
 0x2fb   : > { %v802_v38 = vpop.f32.mrb[2].mxu1 }
 0x2fc   : > { %v818_v33 = vadd.f32 %v802_v38, %v723_v31  ;;  %v1194_v34 = vpop.f32.mrb[3].mxu1 }
 0x2fe   : > { %823 = vst [vmem:[#allocation3 + $0x10] sm:$0xff] %v818_v33 }
 0x2ff   : > { %v807_v37 = vpop.f32.mrb[4].mxu1 }
 0x300   : > { %v819_v40 = vadd.f32 %v807_v37, %v724_v35  ;;  %v1197_v41 = vpop.f32.mrb[5].mxu1  ;;  %829 = sbr.rel (%p1074_p1) target bundleno = 801 (0x321), region = 120 }
 0x301   : > { %v832_v47 = vld [vmem:[#allocation3] sm:$0xff] (!%p1074_p1)  ;;  %v833_v49 = vld [vmem:[#allocation3 + $0x8] sm:$0xff] (!%p1074_p1) }
 0x302   : > { %824 = vst [vmem:[#allocation3 + $0x18] sm:$0xff] %v819_v40 }
 0x303   : > { %v812_v43 = vpop.f32.mrb[6].mxu1 }
 0x304   : > { %v820_v44 = vadd.f32 %v812_v43, %v725_v42  ;;  %v1200_v45 = vpop.f32.mrb[7].mxu1 }
 0x305   : > { %v834_v50 = vld [vmem:[#allocation3 + $0x10] sm:$0xff] (!%p1074_p1) }
 0x306   : > { %825 = vst [vmem:[#allocation3 + $0x20] sm:$0x1] %v820_v44 }
 0x309   : > { %v835_v51 = vld [vmem:[#allocation3 + $0x18] sm:$0xff] }
 0x30d   : > { %v830_v46 = vld [vmem:[#allocation3 + $0x20] sm:$0x1] }
 0x30e   : > { %1361 = vrcp.f32 %v830_v46 }
 0x318   : > { %v1362_v48 = vpop.eup %1361 }
 0x319   : > { %v839_v52 = vrot.slane %v1362_v48, %v1631_v14 }
 0x31b   : > { %v840_v57 = vmul.f32 %v839_v52, %v832_v47  ;;  %v841_v58 = vmul.f32 %v839_v52, %v833_v49  ;;  %v842_v59 = vmul.f32 %v839_v52, %v834_v50  ;;  %v843_v60 = vmul.f32 %v839_v52, %v835_v51 }
 0x31d   : > { %v848_v61 = vadd.f32 %v844_v53, %v840_v57  ;;  %v849_v62 = vadd.f32 %v845_v54, %v841_v58  ;;  %v850_v63 = vadd.f32 %v846_v55, %v842_v59  ;;  %v851_v0 = vadd.f32 %v847_v56, %v843_v60 }
 0x31f   : > { %852 = vst [vmem:[%s1573_s1] sm:$0xff] %v848_v61  ;;  %853 = vst [vmem:[%s1573_s1 + $0x8] sm:$0xff] %v849_v62 }
 0x320   : > { %854 = vst [vmem:[%s1573_s1 + $0x10] sm:$0xff] %v850_v63  ;;  %855 = vst [vmem:[%s1573_s1 + $0x18] sm:$0xff] %v851_v0 }
 0x321 PF: > { %862 = sbr.rel (!%p1527_p6) target bundleno = 809 (0x329), region = 124  ;;  %s1076_s0 = sshll.u32 (%p1527_p6), %s1417_s19, 3 }
 0x322   : > { %s864_s17 = sadd.s32 (%p1527_p6), %s1413_s18, %s1076_s0 }
 0x323   : > { %s1077_s7 = sshll.u32 (%p1527_p6), %s864_s17, 3 }
 0x324   : > { %s866_s12 = scalar_lea.vmem (%p1527_p6), %s1726_s4, %s1077_s7 }
 0x326   : > { %v900_v14 = vld [vmem:[%s1573_s1] sm:$0xff] (%p1527_p6)  ;;  %v902_v1 = vld [vmem:[%s1573_s1 + $0x8] sm:$0xff] (%p1527_p6) }
 0x327   : > { %v904_v2 = vld [vmem:[%s1573_s1 + $0x10] sm:$0xff] (%p1527_p6)  ;;  %v906_v3 = vld [vmem:[%s1573_s1 + $0x18] sm:$0xff] (%p1527_p6)  ;;  %901 = vst [vmem:[%s866_s12] sm:$0xff] (%p1527_p6), %v900_v14  ;;  %903 = vst [vmem:[%s866_s12 + $0x10] sm:$0xff] (%p1527_p6), %v902_v1 }
 0x328   : > { %905 = vst [vmem:[%s866_s12 + $0x20] sm:$0xff] %v904_v2  ;;  %907 = vst [vmem:[%s866_s12 + $0x30] sm:$0xff] %v906_v3 }
 0x329 PF: > { %s14_s23 = sadd.s32 1, %s1433_s23   ;;  %s1733_s15 = smov %s1405_s16 }
 0x32a   : > { %p11_p2 = scmp.ge.s32.totalorder %s14_s23, 10   ;;  %s1734_s16 = smov %s1539_s8 }
 0x32b   : > { %s1735_s17 = smov %s1421_s20  ;;  %s1736_s18 = smov %s1425_s21 }
 0x32c   : > { %s1737_s19 = smov %s1429_s22  ;;  %s1738_s20 = smov %s1742_s24 }
 0x32d   : > { %s1739_s21 = smov %s1746_s25  ;;  %s1740_s22 = smov %s1750_s27 }
 0x32e   :  { %13 = sbr.rel (!%p11_p2) target bundleno = 8 (0x8), region = 209 }

</bundles_post_ra>
